<compile_context>
chip_gen: v7x
topology: tpu7x:2x2x1
jax: 0.10.0
libtpu: 0.0.40
codegen_flags: <defaults>
</compile_context>

<pallas_src>
import jax
import jax.numpy as jnp
from jax.experimental import pallas as pl
from jax.experimental.pallas import tpu as pltpu


def fusion_kernel(mel_ref, sinc_ref, w_ref, out_ref):
    mel = mel_ref[...]                        # (tb, D) native dtype
    sinc = sinc_ref[...]                      # (tb, D) native dtype
    d = mel - sinc                            # (tb, D)

    # Score difference of the 2-way softmax, accumulated in f32 (tb, 1).
    score = jnp.sum(d.astype(jnp.float32) * w_ref[...], axis=-1, keepdims=True)

    # sigmoid(score) == softmax weight assigned to `mel`; the Linear bias
    # cancels exactly (softmax shift-invariance), so it never enters the kernel.
    wgt = pl.reciprocal(1.0 + jnp.exp(-score), approx=False)   # (tb, 1) f32

    # Weighted combine in the native dtype (no full-tile f32 copies of mel/sinc).
    out_ref[...] = (sinc + wgt.astype(mel.dtype) * d).astype(out_ref.dtype)


def _default_batch_tile(B, D, dtype):
    """Largest sane batch tile: (8,128)-aligned, VMEM-friendly, >=2 grid steps."""
    itemsize = jnp.dtype(dtype).itemsize
    align = 16 if itemsize == 2 else 8
    if B <= align:
        return B                              # single block == full array dims (allowed)
    # Keep each block around <=2 MiB so the double-buffered working set
    # (2 inputs + 1 output, 2 buffers each) stays well under v7x's 32 MiB
    # scoped-VMEM default (v7x has only 64 MiB physical VMEM per TensorCore).
    max_rows_by_vmem = max(align, (2 * 1024 * 1024) // (D * itemsize))
    # Guarantee >= 2 grid steps so the "parallel" batch axis can shard across
    # the 2 TensorCores on v7x and DMA/compute pipelining kicks in everywhere.
    max_rows_by_grid = max(align, B // 2)
    tb = min(B, max_rows_by_vmem, max_rows_by_grid)
    return max(align, (tb // align) * align)


def feature_fusion(mel_feat, sinc_feat, weight, bias=None, tb=None):
    """mel_feat, sinc_feat: (B, D). weight: (1, D) or (D,). bias: scalar (cancels, unused)."""
    del bias  # exact: 2-way softmax weights depend only on the score difference
    B, D = mel_feat.shape
    dtype = mel_feat.dtype
    w = jnp.reshape(weight, (1, D)).astype(jnp.float32)

    # Lane-dense padding: make the last dim a multiple of 128 so output stores
    # are unmasked vst. Zero weight in padded lanes keeps the score exact;
    # padded output columns are zero and sliced off below.
    D_pad = ((D + 127) // 128) * 128
    if D_pad != D:
        mel_feat = jnp.pad(mel_feat, ((0, 0), (0, D_pad - D)))
        sinc_feat = jnp.pad(sinc_feat, ((0, 0), (0, D_pad - D)))
        w = jnp.pad(w, ((0, 0), (0, D_pad - D)))

    if tb is None:
        tb = _default_batch_tile(B, D_pad, dtype)

    grid = (pl.cdiv(B, tb),)
    itemsize = jnp.dtype(dtype).itemsize
    cost = pl.CostEstimate(
        flops=6 * B * D_pad,
        transcendentals=B,
        bytes_accessed=3 * B * D_pad * itemsize + 4 * D_pad,
    )

    out = pl.pallas_call(
        fusion_kernel,
        out_shape=jax.ShapeDtypeStruct((B, D_pad), dtype),
        grid=grid,
        in_specs=[
            pl.BlockSpec((tb, D_pad), lambda i: (i, 0)),
            pl.BlockSpec((tb, D_pad), lambda i: (i, 0)),
            pl.BlockSpec((1, D_pad), lambda i: (0, 0)),   # weight stays resident
        ],
        out_specs=pl.BlockSpec((tb, D_pad), lambda i: (i, 0)),
        compiler_params=pltpu.CompilerParams(dimension_semantics=("parallel",)),
        cost_estimate=cost,
    )(mel_feat, sinc_feat, w)

    if D_pad != D:
        out = out[:, :D]
    return out


def feature_fusion_ref(mel_feat, sinc_feat, weight, bias):
    """Pure-JAX reference mirroring the PyTorch forward."""
    feats = jnp.stack([mel_feat, sinc_feat], axis=1)                       # (B, 2, D)
    w = jnp.reshape(weight, (-1,)).astype(jnp.float32)
    scores = jnp.einsum("bkd,d->bk", feats.astype(jnp.float32), w) + bias  # (B, 2)
    weights = jax.nn.softmax(scores, axis=1)[..., None]                    # (B, 2, 1)
    return jnp.sum(feats * weights, axis=1).astype(mel_feat.dtype)         # (B, D)


if __name__ == "__main__":
    # Module default emb_dim=256 (lane-dense), small batch.
    B, D = 8, 256

    key = jax.random.PRNGKey(0)
    k_mel, k_sinc, k_w, k_b = jax.random.split(key, 4)

    mel_feat = jax.random.normal(k_mel, (B, D), dtype=jnp.float32)
    sinc_feat = jax.random.normal(k_sinc, (B, D), dtype=jnp.float32)

    # Deterministic init of nn.Linear(emb_dim, 1): weight (1, D), bias scalar
    bound = 1.0 / (D ** 0.5)
    w = jax.random.uniform(k_w, (1, D), minval=-bound, maxval=bound, dtype=jnp.float32)
    b = jax.random.uniform(k_b, (), minval=-bound, maxval=bound, dtype=jnp.float32)

    out = feature_fusion(mel_feat, sinc_feat, w, b)
    out = jax.block_until_ready(out)

    ref = feature_fusion_ref(mel_feat, sinc_feat, w, b)
    assert out.shape == (B, D)
    assert jnp.allclose(out, ref, atol=1e-5, rtol=1e-5), "mismatch vs reference"

    # Also exercise the non-lane-aligned (padded) path at D=32.
    B2, D2 = 2, 32
    mel2 = jax.random.normal(jax.random.PRNGKey(1), (B2, D2), dtype=jnp.float32)
    sinc2 = jax.random.normal(jax.random.PRNGKey(2), (B2, D2), dtype=jnp.float32)
    w2 = jax.random.uniform(jax.random.PRNGKey(3), (1, D2), minval=-0.2, maxval=0.2,
                            dtype=jnp.float32)
    out2 = jax.block_until_ready(feature_fusion(mel2, sinc2, w2, 0.3))
    ref2 = feature_fusion_ref(mel2, sinc2, w2, 0.3)
    assert jnp.allclose(out2, ref2, atol=1e-5, rtol=1e-5), "mismatch vs reference (padded)"

    print("KERNEL_OK")
</pallas_src>

<mosaic_0001>
module attributes {stable_mosaic.version = 11 : i64} {
  func.func @fusion_kernel(%arg0: i32, %arg1: memref<8x256xf32, #tpu.memory_space<vmem>>, %arg2: memref<8x256xf32, #tpu.memory_space<vmem>>, %arg3: memref<1x256xf32, #tpu.memory_space<vmem>>, %arg4: memref<8x256xf32, #tpu.memory_space<vmem>>) attributes {dimension_semantics = [#tpu.dimension_semantics<parallel>], iteration_bounds = array<i64: 1>, scalar_prefetch = 0 : i64, scratch_operands = 0 : i64, tpu.core_type = #tpu.core_type<tc>, window_params = [{transform_indices = @transform_0, window_bounds = array<i64: 8, 256>}, {transform_indices = @transform_1, window_bounds = array<i64: 8, 256>}, {pipeline_mode = #tpu.pipeline_mode<synchronous>, transform_indices = @transform_2, window_bounds = array<i64: 1, 256>}, {transform_indices = @transform_3, window_bounds = array<i64: 8, 256>}]} {
    %c0 = arith.constant 0 : index
    %c0_0 = arith.constant 0 : index
    %0 = vector.load %arg1[%c0, %c0_0] : memref<8x256xf32, #tpu.memory_space<vmem>>, vector<8x256xf32>
    %c0_1 = arith.constant 0 : index
    %c0_2 = arith.constant 0 : index
    %1 = vector.load %arg2[%c0_1, %c0_2] : memref<8x256xf32, #tpu.memory_space<vmem>>, vector<8x256xf32>
    %2 = arith.subf %0, %1 : vector<8x256xf32>
    %c0_3 = arith.constant 0 : index
    %c0_4 = arith.constant 0 : index
    %3 = vector.load %arg3[%c0_3, %c0_4] : memref<1x256xf32, #tpu.memory_space<vmem>>, vector<1x256xf32>
    %4 = vector.broadcast %3 : vector<1x256xf32> to vector<8x256xf32>
    %5 = arith.mulf %2, %4 : vector<8x256xf32>
    %cst = arith.constant dense<0.000000e+00> : vector<8xf32>
    %6 = vector.multi_reduction <add>, %5, %cst [1] : vector<8x256xf32> to vector<8xf32>
    %7 = vector.shape_cast %6 : vector<8xf32> to vector<8x1xf32>
    %cst_5 = arith.constant 0.000000e+00 : f32
    %8 = vector.broadcast %cst_5 : f32 to vector<8x1xf32>
    %9 = arith.subf %8, %7 : vector<8x1xf32>
    %10 = math.exp %9 : vector<8x1xf32>
    %cst_6 = arith.constant 1.000000e+00 : f32
    %11 = vector.broadcast %cst_6 : f32 to vector<8x1xf32>
    %12 = arith.addf %11, %10 : vector<8x1xf32>
    %13 = tpu.reciprocal %12 : vector<8x1xf32> -> vector<8x1xf32>
    %14 = vector.broadcast %13 : vector<8x1xf32> to vector<8x256xf32>
    %15 = arith.mulf %14, %2 : vector<8x256xf32>
    %16 = arith.addf %1, %15 : vector<8x256xf32>
    %c0_7 = arith.constant 0 : index
    %c0_8 = arith.constant 0 : index
    %17 = vector.load %arg4[%c0_7, %c0_8] : memref<8x256xf32, #tpu.memory_space<vmem>>, vector<8x256xf32>
    tpu.vector_store %arg4[%c0_7, %c0_8], %16 {strides = array<i32>} : memref<8x256xf32, #tpu.memory_space<vmem>>, vector<8x256xf32>,
    return
  }
  func.func @transform_0(%arg0: i32) -> (i32, i32) {
    %c0_i32 = arith.constant 0 : i32
    %c0_i32_0 = arith.constant 0 : i32
    return %arg0, %c0_i32 : i32, i32
  }
  func.func @transform_1(%arg0: i32) -> (i32, i32) {
    %c0_i32 = arith.constant 0 : i32
    %c0_i32_0 = arith.constant 0 : i32
    return %arg0, %c0_i32 : i32, i32
  }
  func.func @transform_2(%arg0: i32) -> (i32, i32) {
    %c0_i32 = arith.constant 0 : i32
    %c0_i32_0 = arith.constant 0 : i32
    %c0_i32_1 = arith.constant 0 : i32
    return %c0_i32, %c0_i32_0 : i32, i32
  }
  func.func @transform_3(%arg0: i32) -> (i32, i32) {
    %c0_i32 = arith.constant 0 : i32
    %c0_i32_0 = arith.constant 0 : i32
    return %arg0, %c0_i32 : i32, i32
  }
}

</mosaic_0001>

<bundles_post_ra>
// kernel: tpu_custom_call.1
= control target key start
LH: loop header
LB: loop body
LE: loop exit
PB: predicated region body
PF: predicated region fallthrough
CT: control target
= control target key end

     0   :  { %8 = vsyncpa [#allocation3], 0  ;;  %s230_s0 = inlined_call_operand.hbm [shape: f32[8,256], index: 0, kind: input, shape index: {}]   ;;  %s231_s1 = inlined_call_operand.hbm [shape: f32[8,256], index: 1, kind: input, shape index: {}]   ;;  %s232_s2 = inlined_call_operand.vmem [shape: f32[1,256], index: 2, kind: input, shape index: {}]   ;;  %s233_s3 = inlined_call_operand.hbm [shape: f32[8,256], index: 3, kind: output, shape index: {}]  }
   0x1   :  { %9 = vsyncpa [#allocation6], 0 }
   0x2   :  { %10 = vsyncpa [#allocation4], 0  ;;  %s168_s12 = smov [#allocation2]   ;;  %s169_s14 = smov [#allocation5]  }
   0x3   :  { %s17_s13 = sshll.u32 %s168_s12, 4  ;;  %s27_s15 = sshll.u32 %s169_s14, 4  ;;  %s18_s13 = int_to_ptr.vmem [resolvable:$true] %s17_s13  ;;  %s28_s15 = int_to_ptr.vmem [resolvable:$true] %s27_s15 }
   0x4   :  { %s96_s18 = scalar_lea.hbm %s230_s0, 256 }
   0x5   :  { %p97_p0 = scmp.ne.s32.totalorder %s230_s0, %s96_s18  ;;  %p100_p1 = scmp.lt.u32.totalorder %s96_s18, %s230_s0 }
   0x7   :  { %p102_p2 = pnand %p100_p1, %p97_p0 }
   0x9   :  { %105 = shalt.err (!%p102_p2)
}
   0xa   :  { %s106_s23 = scalar_lea.vmem %s18_s13, 256  ;;  %p111_p4 = scmp.lt.s32.totalorder %s18_s13, %s18_s13 }
   0xb   :  { %p107_p3 = scmp.ne.s32.totalorder %s18_s13, %s106_s23  ;;  %p112_p5 = scmp.lt.s32.totalorder %s106_s23, %s106_s23 }
   0xd   :  { %p113_p6 = por %p112_p5, %p111_p4 }
   0xf   :  { %p114_p7 = pnand %p113_p6, %p107_p3 }
  0x11   :  { %117 = shalt.err (!%p114_p7)
}
  0x12   :  { %20 = dma.hbm_to_vmem [thread:$0]  %s230_s0, 256, %s18_s13, [#allocation3]  }
  0x13   :  { %s118_s28 = scalar_lea.hbm %s231_s1, 256 }
  0x14   :  { %p119_p8 = scmp.ne.s32.totalorder %s231_s1, %s118_s28  ;;  %p122_p9 = scmp.lt.u32.totalorder %s118_s28, %s231_s1 }
  0x16   :  { %p124_p10 = pnand %p122_p9, %p119_p8 }
  0x18   :  { %127 = shalt.err (!%p124_p10)
}
  0x19   :  { %s128_s6 = scalar_lea.vmem %s28_s15, 256  ;;  %p133_p12 = scmp.lt.s32.totalorder %s28_s15, %s28_s15 }
  0x1a   :  { %p129_p11 = scmp.ne.s32.totalorder %s28_s15, %s128_s6  ;;  %p134_p13 = scmp.lt.s32.totalorder %s128_s6, %s128_s6 }
  0x1c   :  { %p135_p0 = por %p134_p13, %p133_p12 }
  0x1e   :  { %p136_p1 = pnand %p135_p0, %p129_p11 }
  0x20   :  { %139 = shalt.err (!%p136_p1)
}
  0x21   :  { %30 = dma.hbm_to_vmem [thread:$0]  %s231_s1, 256, %s28_s15, [#allocation6]  }
  0x22   :  { %162 = dma.done.wait [#allocation3], 256  }
  0x23   :  { %163 = vsyncadd [#allocation3], 4294967040 }
  0x24   :  { %164 = dma.done.wait [#allocation6], 256  }
  0x25   :  { %165 = vsyncadd [#allocation6], 4294967040  ;;  %v47_v0 = vlaneseq  ;;  %v39_v4 = vld [vmem:[#allocation2] sm:$0xff]  ;;  %v40_v5 = vld [vmem:[#allocation2 + $0x8] sm:$0xff]  ;;  %s170_s1 = smov [#allocation7]  }
  0x26   :  { %v41_v6 = vld [vmem:[#allocation5] sm:$0xff]  ;;  %v42_v7 = vld [vmem:[#allocation5 + $0x8] sm:$0xff]  ;;  %v45_v9 = vld [vmem:[%s232_s2] sm:$0x3]  ;;  %s79_s10 = sshll.u32 %s170_s1, 4  ;;  %s80_s10 = int_to_ptr.vmem [resolvable:$true] %s79_s10 }
  0x27   :  { %v48_v1 = vshrl.u32 %v47_v0, 7  ;;  %v43_v8 = vsub.f32 %v39_v4, %v41_v6  ;;  %v44_v10 = vsub.f32 %v40_v5, %v42_v7  ;;  %s140_s2 = scalar_lea.vmem %s80_s10, 256  ;;  %p145_p3 = scmp.lt.s32.totalorder %s80_s10, %s80_s10 }
  0x28   :  { %p141_p2 = scmp.ne.s32.totalorder %s80_s10, %s140_s2  ;;  %p146_p4 = scmp.lt.s32.totalorder %s140_s2, %s140_s2 }
  0x29   :  { %v49_v2 = vsub.s32 0, %v48_v1  ;;  %v53_v3 = vsub.s32 1, %v48_v1 }
  0x2a   :  { %p147_p5 = por %p146_p4, %p145_p3 }
  0x2b   :  { %v50_v11 = vrot.slane %v45_v9, %v49_v2  ;;  %v54_v12 = vrot.slane %v45_v9, %v53_v3 }
  0x2c   :  { %p148_p6 = pnand %p147_p5, %p141_p2 }
  0x2d   :  { %v57_v13 = vmul.f32 %v50_v11, %v43_v8  ;;  %v58_v14 = vmul.f32 %v54_v12, %v44_v10 }
  0x2f   :  { %v59_v15 = vadd.f32 %v58_v14, %v57_v13 }
  0x31   :  { %60 = vadd.xlane.f32.xlu0 %v59_v15 }
  0xbe   :  { %v61_v16 = vpop.xlane.xlu0 %60 }
  0xbf   :  { %v62_v17 = vsub.f32 0.0, %v61_v16 }
  0xc1   :  { %v63_v18 = vmul.f32 1.442695, %v62_v17 }
  0xc3   :  { %92 = vpow2.f32 %v63_v18 }
  0xcd   :  { %v93_v19 = vpop.eup %92 }
  0xce   :  { %v65_v20 = vadd.f32 1.0, %v93_v19 }
  0xd0   :  { %94 = vrcp.f32 %v65_v20 }
  0xda   :  { %v95_v21 = vpop.eup %94 }
  0xdb   :  { %v67_v22 = vmul.f32 %v95_v21, %v43_v8  ;;  %v68_v23 = vmul.f32 %v95_v21, %v44_v10 }
  0xdd   :  { %v69_v24 = vadd.f32 %v67_v22, %v41_v6  ;;  %v70_v25 = vadd.f32 %v68_v23, %v42_v7 }
  0xdf   :  { %71 = vst [vmem:[#allocation7] sm:$0xff] %v69_v24  ;;  %72 = vst [vmem:[#allocation7 + $0x8] sm:$0xff] %v70_v25 }
  0xe0   :  { %151 = shalt.err (!%p148_p6)
}
  0xe1   :  { %s152_s13 = scalar_lea.hbm %s233_s3, 256 }
  0xe2   :  { %p153_p7 = scmp.ne.s32.totalorder %s233_s3, %s152_s13  ;;  %p156_p8 = scmp.lt.u32.totalorder %s152_s13, %s233_s3 }
  0xe4   :  { %p158_p9 = pnand %p156_p8, %p153_p7 }
  0xe6   :  { %161 = shalt.err (!%p158_p9)
}
  0xe7   :  { %82 = dma.vmem_to_hbm [thread:$0]  %s80_s10, 256, %s233_s3, [#allocation4]  }
  0xe8   :  { %166 = dma.done.wait [#allocation4], 256  }
  0xe9   :  { %167 = vsyncadd [#allocation4], 4294967040 }
  0xea   :  { %86 = vsyncpa [#allocation3], 1 }
  0xeb   :  { %87 = vsyncpa [#allocation6], 1 }
  0xec   :  { %88 = vsyncpa [#allocation4], 1 }

</bundles_post_ra>
